<compile_context>
chip_gen: v6e
topology: v6e:2x2x1
jax: 0.10.0
libtpu: 0.0.40
codegen_flags: <defaults>
</compile_context>

<pallas_src>
import functools

import jax
import jax.numpy as jnp
from jax import lax
from jax.experimental import pallas as pl
from jax.experimental.pallas import tpu as pltpu


def _loss_kernel(x_ref, t_ref, *rest, beta, aggregate, n_rows, tile_rows,
                 weighted, mask_rows):
    """x (TN,C), t (TN,1) [, w (TN,1)] -> o (1,1) accumulator or (TN,1) rows."""
    if weighted:
        w_ref, o_ref = rest
    else:
        (o_ref,) = rest

    x = x_ref[...].astype(jnp.float32)              # (TN, C); f32 cast in-kernel
    t = t_ref[...]                                  # (TN, 1) int32

    # log-softmax pieces in shifted space
    m = jnp.max(x, axis=1, keepdims=True)           # (TN, 1)   XLU row max
    s = x - m                                       # (TN, C)   VPU
    lse = jnp.log(jnp.sum(jnp.exp(s), axis=1, keepdims=True))   # EUP + XLU

    # gather s[target] via one-hot compare (no gather op on TPU)
    col = lax.broadcasted_iota(jnp.int32, x.shape, 1)            # (TN, C)
    s_gt = jnp.sum(jnp.where(col == t, s, 0.0), axis=1, keepdims=True)  # (TN, 1)

    # loss = -(1-beta)*logpt_gt - beta*logpt_pred  ==  lse - (1-beta)*s_gt
    loss = lse - (1.0 - beta) * s_gt                # (TN, 1)

    if weighted:
        loss = loss * jnp.exp(w_ref[...].astype(jnp.float32))

    if mask_rows:
        # last tile may run past N; zero the padded rows so reductions stay exact
        row = (pl.program_id(0) * tile_rows
               + lax.broadcasted_iota(jnp.int32, loss.shape, 0))
        loss = jnp.where(row < n_rows, loss, 0.0)

    if aggregate is None:
        o_ref[...] = loss
    else:
        @pl.when(pl.program_id(0) == 0)
        def _():
            o_ref[...] = jnp.zeros_like(o_ref)

        o_ref[...] += jnp.sum(loss)                 # resident (1,1) accumulator

        if aggregate == "mean":
            # single divide, applied once on the final grid step
            @pl.when(pl.program_id(0) == pl.num_programs(0) - 1)
            def _():
                o_ref[...] = o_ref[...] / jnp.float32(n_rows)


def smoothlabel_class_cross_entropy_loss(
    logits, target, weights=None, *, beta=0.0, aggregate="mean", weighted=0,
    tile_rows=None,
):
    """JAX/Pallas equivalent of SmoothlabelClassCrossEntropyLoss.forward.

    logits:  (N, C) float (any float dtype; no wrapper upcast — HBM reads stay
             in the native dtype, the f32 cast happens in-kernel)
    target:  (N,) or (N, 1) integer class indices
    weights: (N,) float, required iff weighted == 1
    """
    assert aggregate in ("sum", "mean", None)
    assert logits.ndim == 2
    N, C = logits.shape

    if target.ndim == 2:
        target = target[:, 0]
    assert target.ndim == 1 and target.shape[0] == N
    t2d = target.astype(jnp.int32).reshape(N, 1)

    in_itemsize = jnp.dtype(logits.dtype).itemsize

    # --- row tile size: biggest tile under a ~16 MiB working budget ----------
    # budget covers the double-buffered input block, ~4 live f32 (TN, C)
    # temporaries, and the lane-padded narrow (TN, 1) blocks (512 B/row/buf).
    if tile_rows is None:
        budget = 16 * 1024 * 1024
        narrow_blocks = 1 + (1 if weighted == 1 else 0) \
                          + (1 if aggregate is None else 0)
        per_row = C * (2 * in_itemsize + 4 * 4) + narrow_blocks * 2 * 512
        tn = max(8, budget // per_row)
        tn = min(int(tn), 1024)
        tn = (tn // 8) * 8
    else:
        tn = int(tile_rows)
    if tn >= N:
        tn = N                        # single full-extent block is always legal
    else:
        tn = max(8, (tn // 8) * 8)    # (8, 128) sublane constraint

    grid = (pl.cdiv(N, tn),)
    mask_rows = (N % tn) != 0

    in_specs = [
        pl.BlockSpec((tn, C), lambda i: (i, 0)),
        pl.BlockSpec((tn, 1), lambda i: (i, 0)),
    ]
    args = [logits, t2d]              # no wrapper upcast of logits

    if weighted == 1:
        assert weights is not None and weights.shape == (N,)
        in_specs.append(pl.BlockSpec((tn, 1), lambda i: (i, 0)))
        args.append(weights.reshape(N, 1))

    if aggregate is None:
        out_shape = jax.ShapeDtypeStruct((N, 1), jnp.float32)
        out_spec = pl.BlockSpec((tn, 1), lambda i: (i, 0))
        dims = ("parallel",)          # independent per-row tiles -> megacore
    else:
        out_shape = jax.ShapeDtypeStruct((1, 1), jnp.float32)
        out_spec = pl.BlockSpec((1, 1), lambda i: (0, 0))
        dims = ("arbitrary",)         # output block is a running accumulator

    kernel = functools.partial(
        _loss_kernel, beta=float(beta), aggregate=aggregate, n_rows=N,
        tile_rows=tn, weighted=(weighted == 1), mask_rows=mask_rows)

    bytes_accessed = N * C * in_itemsize + N * 4
    if weighted == 1:
        bytes_accessed += N * jnp.dtype(weights.dtype).itemsize
    if aggregate is None:
        bytes_accessed += N * 4
    cost = pl.CostEstimate(flops=5 * N * C, transcendentals=N * C,
                           bytes_accessed=int(bytes_accessed))

    out = pl.pallas_call(
        kernel,
        out_shape=out_shape,
        grid=grid,
        in_specs=in_specs,
        out_specs=out_spec,
        compiler_params=pltpu.CompilerParams(
            dimension_semantics=dims,
            vmem_limit_bytes=32 * 1024 * 1024),
        cost_estimate=cost,
    )(*args)

    if aggregate is None:
        return out.reshape(N)
    return out[0, 0]


def _reference(logits, target, weights=None, *, beta=0.0, aggregate="mean",
               weighted=0):
    logpt = jax.nn.log_softmax(logits.astype(jnp.float32), axis=1)
    logpt_gt = jnp.take_along_axis(logpt, target.reshape(-1, 1), axis=1)[:, 0]
    logpt_pred = jnp.max(logpt, axis=1)
    loss = -(1.0 - beta) * logpt_gt - beta * logpt_pred
    if weighted == 1:
        loss = loss * jnp.exp(weights.astype(jnp.float32))
    if aggregate == "sum":
        return loss.sum()
    if aggregate == "mean":
        return loss.mean()
    return loss


if __name__ == "__main__":
    key = jax.random.PRNGKey(0)
    k1, k2, k3, k4, k5, k6 = jax.random.split(key, 6)

    beta = 0.1
    C = 32

    # 1) single-block path: mean, unweighted, f32
    N1 = 8
    logits1 = jax.random.normal(k1, (N1, C), dtype=jnp.float32) * 2.0
    target1 = jax.random.randint(k2, (N1,), 0, C, dtype=jnp.int32)
    out1 = smoothlabel_class_cross_entropy_loss(
        logits1, target1, beta=beta, aggregate="mean", weighted=0)
    out1 = jax.block_until_ready(out1)
    ref1 = _reference(logits1, target1, beta=beta, aggregate="mean", weighted=0)
    assert jnp.allclose(out1, ref1, atol=1e-5, rtol=1e-5), (out1, ref1)

    # 2) multi-block row grid with partial last tile + accumulator:
    #    sum, weighted, bf16 logits (no wrapper upcast)
    N2 = 20
    logits2 = (jax.random.normal(k3, (N2, C), dtype=jnp.float32) * 2.0
               ).astype(jnp.bfloat16)
    target2 = jax.random.randint(k4, (N2,), 0, C, dtype=jnp.int32)
    weights2 = jax.random.normal(k5, (N2,), dtype=jnp.float32) * 0.1
    out2 = smoothlabel_class_cross_entropy_loss(
        logits2, target2, weights2, beta=beta, aggregate="sum", weighted=1,
        tile_rows=8)
    out2 = jax.block_until_ready(out2)
    ref2 = _reference(logits2, target2, weights2, beta=beta, aggregate="sum",
                      weighted=1)
    assert jnp.allclose(out2, ref2, atol=1e-3, rtol=1e-4), (out2, ref2)

    # 3) multi-block mean path (exercises the last-step divide-by-N)
    out2m = smoothlabel_class_cross_entropy_loss(
        logits2, target2, weights2, beta=beta, aggregate="mean", weighted=1,
        tile_rows=8)
    out2m = jax.block_until_ready(out2m)
    ref2m = _reference(logits2, target2, weights2, beta=beta, aggregate="mean",
                       weighted=1)
    assert jnp.allclose(out2m, ref2m, atol=1e-3, rtol=1e-4), (out2m, ref2m)

    # 4) per-sample losses (aggregate=None), multi-block, parallel row axis
    N3 = 16
    logits3 = jax.random.normal(k6, (N3, C), dtype=jnp.float32) * 2.0
    target3 = jax.random.randint(k2, (N3,), 0, C, dtype=jnp.int32)
    out3 = smoothlabel_class_cross_entropy_loss(
        logits3, target3, beta=beta, aggregate=None, weighted=0, tile_rows=8)
    out3 = jax.block_until_ready(out3)
    ref3 = _reference(logits3, target3, beta=beta, aggregate=None, weighted=0)
    assert jnp.allclose(out3, ref3, atol=1e-5, rtol=1e-5), (out3, ref3)

    print("KERNEL_OK")
</pallas_src>

<mosaic_0001>
module attributes {stable_mosaic.version = 11 : i64} {
  func.func @_loss_kernel(%arg0: i32, %arg1: memref<8x32xf32, #tpu.memory_space<vmem>>, %arg2: memref<8x1xi32, #tpu.memory_space<vmem>>, %arg3: memref<1x1xf32, #tpu.memory_space<vmem>>) attributes {dimension_semantics = [#tpu.dimension_semantics<arbitrary>], iteration_bounds = array<i64: 1>, scalar_prefetch = 0 : i64, scratch_operands = 0 : i64, tpu.core_type = #tpu.core_type<tc>, window_params = [{transform_indices = @transform_0, window_bounds = array<i64: 8, 32>}, {transform_indices = @transform_1, window_bounds = array<i64: 8, 1>}, {pipeline_mode = #tpu.pipeline_mode<synchronous>, transform_indices = @transform_2, window_bounds = array<i64: 1, 1>}]} {
    %c0 = arith.constant 0 : index
    %c0_0 = arith.constant 0 : index
    %0 = vector.load %arg1[%c0, %c0_0] : memref<8x32xf32, #tpu.memory_space<vmem>>, vector<8x32xf32>
    %c0_1 = arith.constant 0 : index
    %c0_2 = arith.constant 0 : index
    %1 = vector.load %arg2[%c0_1, %c0_2] : memref<8x1xi32, #tpu.memory_space<vmem>>, vector<8x1xi32>
    %cst = arith.constant dense<0xFF800000> : vector<8xf32>
    %2 = vector.multi_reduction <maximumf>, %0, %cst [1] : vector<8x32xf32> to vector<8xf32>
    %3 = vector.shape_cast %2 : vector<8xf32> to vector<8x1xf32>
    %4 = vector.broadcast %3 : vector<8x1xf32> to vector<8x32xf32>
    %5 = arith.subf %0, %4 : vector<8x32xf32>
    %6 = math.exp %5 : vector<8x32xf32>
    %cst_3 = arith.constant dense<0.000000e+00> : vector<8xf32>
    %7 = vector.multi_reduction <add>, %6, %cst_3 [1] : vector<8x32xf32> to vector<8xf32>
    %8 = vector.shape_cast %7 : vector<8xf32> to vector<8x1xf32>
    %9 = math.log %8 : vector<8x1xf32>
    %10 = tpu.iota {dimensions = array<i32: 1>} : vector<8x32xi32>
    %11 = vector.broadcast %1 : vector<8x1xi32> to vector<8x32xi32>
    %12 = arith.cmpi eq, %10, %11 : vector<8x32xi32>
    %cst_4 = arith.constant 0.000000e+00 : f32
    %13 = vector.broadcast %cst_4 : f32 to vector<8x32xf32>
    %14 = arith.select %12, %5, %13 : vector<8x32xi1>, vector<8x32xf32>
    %cst_5 = arith.constant dense<0.000000e+00> : vector<8xf32>
    %15 = vector.multi_reduction <add>, %14, %cst_5 [1] : vector<8x32xf32> to vector<8xf32>
    %16 = vector.shape_cast %15 : vector<8xf32> to vector<8x1xf32>
    %cst_6 = arith.constant 0.899999976 : f32
    %17 = vector.broadcast %cst_6 : f32 to vector<8x1xf32>
    %18 = arith.mulf %17, %16 : vector<8x1xf32>
    %19 = arith.subf %9, %18 : vector<8x1xf32>
    %c0_i32 = arith.constant 0 : i32
    %20 = arith.cmpi eq, %arg0, %c0_i32 : i32
    %21 = arith.extui %20 : i1 to i32
    %c0_i32_7 = arith.constant 0 : i32
    %22 = arith.cmpi ne, %21, %c0_i32_7 : i32
    scf.if %22 {
      %cst_15 = arith.constant 0.000000e+00 : f32
      %34 = vector.broadcast %cst_15 : f32 to vector<1x1xf32>
      %c0_16 = arith.constant 0 : index
      %c0_17 = arith.constant 0 : index
      %35 = vector.load %arg3[%c0_16, %c0_17] : memref<1x1xf32, #tpu.memory_space<vmem>>, vector<1x1xf32>
      tpu.vector_store %arg3[%c0_16, %c0_17], %34 {strides = array<i32>} : memref<1x1xf32, #tpu.memory_space<vmem>>, vector<1x1xf32>,
    } else {
    }
    %c0_8 = arith.constant 0 : index
    %c0_9 = arith.constant 0 : index
    %23 = vector.load %arg3[%c0_8, %c0_9] : memref<1x1xf32, #tpu.memory_space<vmem>>, vector<1x1xf32>
    %24 = vector.shape_cast %19 : vector<8x1xf32> to vector<1x8x1xf32>
    %cst_10 = arith.constant dense<0.000000e+00> : vector<1xf32>
    %25 = vector.multi_reduction <add>, %24, %cst_10 [1, 2] : vector<1x8x1xf32> to vector<1xf32>
    %26 = vector.shape_cast %25 : vector<1xf32> to vector<1x1x1xf32>
    %27 = vector.extract %26[0, 0, 0] : f32 from vector<1x1x1xf32>
    %28 = vector.broadcast %27 : f32 to vector<1x1xf32>
    %29 = arith.addf %23, %28 : vector<1x1xf32>
    %c0_11 = arith.constant 0 : index
    %c0_12 = arith.constant 0 : index
    %30 = vector.load %arg3[%c0_11, %c0_12] : memref<1x1xf32, #tpu.memory_space<vmem>>, vector<1x1xf32>
    tpu.vector_store %arg3[%c0_11, %c0_12], %29 {strides = array<i32>} : memref<1x1xf32, #tpu.memory_space<vmem>>, vector<1x1xf32>,
    %c0_i32_13 = arith.constant 0 : i32
    %31 = arith.cmpi eq, %arg0, %c0_i32_13 : i32
    %32 = arith.extui %31 : i1 to i32
    %c0_i32_14 = arith.constant 0 : i32
    %33 = arith.cmpi ne, %32, %c0_i32_14 : i32
    scf.if %33 {
      %c0_15 = arith.constant 0 : index
      %c0_16 = arith.constant 0 : index
      %34 = vector.load %arg3[%c0_15, %c0_16] : memref<1x1xf32, #tpu.memory_space<vmem>>, vector<1x1xf32>
      %cst_17 = arith.constant 8.000000e+00 : f32
      %35 = vector.broadcast %cst_17 : f32 to vector<1x1xf32>
      %36 = arith.divf %34, %35 : vector<1x1xf32>
      %c0_18 = arith.constant 0 : index
      %c0_19 = arith.constant 0 : index
      %37 = vector.load %arg3[%c0_18, %c0_19] : memref<1x1xf32, #tpu.memory_space<vmem>>, vector<1x1xf32>
      tpu.vector_store %arg3[%c0_18, %c0_19], %36 {strides = array<i32>} : memref<1x1xf32, #tpu.memory_space<vmem>>, vector<1x1xf32>,
    } else {
    }
    return
  }
  func.func @transform_0(%arg0: i32) -> (i32, i32) {
    %c0_i32 = arith.constant 0 : i32
    %c0_i32_0 = arith.constant 0 : i32
    return %arg0, %c0_i32 : i32, i32
  }
  func.func @transform_1(%arg0: i32) -> (i32, i32) {
    %c0_i32 = arith.constant 0 : i32
    %c0_i32_0 = arith.constant 0 : i32
    return %arg0, %c0_i32 : i32, i32
  }
  func.func @transform_2(%arg0: i32) -> (i32, i32) {
    %c0_i32 = arith.constant 0 : i32
    %c0_i32_0 = arith.constant 0 : i32
    %c0_i32_1 = arith.constant 0 : i32
    return %c0_i32, %c0_i32_0 : i32, i32
  }
}

</mosaic_0001>

<bundles_post_ra>
// kernel: tpu_custom_call.1
= control target key start
LH: loop header
LB: loop body
LE: loop exit
PB: predicated region body
PF: predicated region fallthrough
CT: control target
= control target key end

     0   :  { %vm14_vm0 = vcmask 261120   ;;  %s146_s0 = inlined_call_operand.vmem [shape: f32[8,32], index: 0, kind: input, shape index: {}]   ;;  %s147_s1 = inlined_call_operand.vmem [shape: s32[8,1], index: 1, kind: input, shape index: {}]   ;;  %s148_s2 = inlined_call_operand.hbm [shape: f32[1,1], index: 2, kind: output, shape index: {}]  }
   0x1   :  { %v12_v0 = vld [vmem:[%s146_s0] sm:$0xff] }
   0x2   :  { %7 = vsyncpa [#allocation3], 0  ;;  %v15_v1 = vsel %vm14_vm0, %v12_v0, -inf  ;;  %v113_v2 = vmov 0   ;;  %v13_v3 = vld [vmem:[%s147_s1] sm:$0xff]  ;;  %v26_v7 = vlaneseq  ;;  %vm45_vm2 = vcmask 7168  }
   0x3   :  { %86 = vset.pattern.permute.xlu0 %v113_v2  ;;  %vm42_vm3 = vcmask 0   ;;  %v114_v21 = vmov 0.0   ;;  %s115_s1 = smov [#allocation2]  }
   0x4   :  { %16 = vmax.xlane.f32.xlu0 %v15_v1  ;;  %v27_v8 = vand.u32 127, %v26_v7  ;;  %43 = vst.msk [vmem:[#allocation2] sm:$0x1] %vm42_vm3, %v114_v21  ;;  %s73_s13 = sshll.u32 %s115_s1, 4  ;;  %s74_s13 = int_to_ptr.vmem [resolvable:$true] %s73_s13 }
   0x5   :  { %s91_s14 = scalar_lea.vmem %s74_s13, 16  ;;  %s95_s15 = scalar_lea.vmem %s74_s13, 32 }
   0x6   :  { %p92_p0 = scmp.ne.s32.totalorder %s74_s13, %s91_s14  ;;  %p96_p1 = scmp.lt.s32.totalorder %s74_s13, %s74_s13 }
   0x7   :  { %p97_p2 = scmp.lt.s32.totalorder %s95_s15, %s91_s14 }
   0x9   :  { %p98_p3 = por %p97_p2, %p96_p1 }
   0xb   :  { %v44_v29 = vld [vmem:[#allocation2] sm:$0x1]  ;;  %p99_p4 = pnand %p98_p3, %p92_p0 }
  0x1a   :  { %29 = vperm.xlu0 %86, %v13_v3  }
  0x8d   :  { %v17_v4 = vpop.xlane.xlu0 %16 }
  0x8e   :  { %v18_v5 = vsub.f32 %v12_v0, %v17_v4 }
  0x90   :  { %v19_v6 = vmul.f32 1.442695, %v18_v5 }
  0x92   :  { %87 = vpow2.f32 %v19_v6 }
  0x95   :  { %v30_v9 = vpop.permute.xlu0 %29 }
  0x96   :  { %vm31_vm1 = vcmp.eq.s32.totalorder %v27_v8, %v30_v9 }
  0x97   :  { %v32_v12 = vsel %vm31_vm1, %v18_v5, 0.0 }
  0x98   :  { %v33_v13 = vsel %vm14_vm0, %v32_v12, 0.0 }
  0x9f   :  { %v88_v10 = vpop.eup %87 }
  0xa0   :  { %v21_v11 = vsel %vm14_vm0, %v88_v10, 0.0 }
  0xa1   :  { %22 = vadd.xlane.f32.xlu1 %v21_v11 }
  0xa5   :  { %34 = vadd.xlane.f32.xlu1 %v33_v13 }
 0x12a   :  { %v23_v14 = vpop.xlane.xlu1 %22 }
 0x12b   :  { %89 = vlog2.f32 %v23_v14 }
 0x12e   :  { %v35_v15 = vpop.xlane.xlu1 %34 }
 0x12f   :  { %v36_v18 = vmul.f32 0.9, %v35_v15 }
 0x138   :  { %v90_v16 = vpop.eup %89 }
 0x139   :  { %v25_v17 = vmul.f32 0.6931472, %v90_v16 }
 0x13b   :  { %v37_v19 = vsub.f32 %v25_v17, %v36_v18 }
 0x13d   :  { %v46_v20 = vsel %vm45_vm2, %v37_v19, 0.0 }
 0x13e   :  { %47 = vadd.xlane.f32.xlu1 %v46_v20 }
 0x1c7   :  { %v48_v22 = vpop.xlane.xlu1 %47 }
 0x1c8   :  { %v49_v23 = vrot.slane %v48_v22, 4 }
 0x1ca   :  { %v50_v24 = vadd.f32 %v49_v23, %v48_v22 }
 0x1cc   :  { %v51_v25 = vrot.slane %v50_v24, 2 }
 0x1ce   :  { %v52_v26 = vadd.f32 %v51_v25, %v50_v24 }
 0x1d0   :  { %v53_v27 = vrot.slane %v52_v26, 1 }
 0x1d2   :  { %v54_v28 = vadd.f32 %v53_v27, %v52_v26 }
 0x1d4   :  { %81 = vpush %v54_v28 }
 0x205   :  { %s82_s0 = spop %81 }
 0x206   :  { %v56_v30 = vstv %s82_s0 }
 0x207   :  { %v57_v31 = vadd.f32 %v56_v30, %v44_v29 }
 0x209   :  { %59 = vst.msk [vmem:[#allocation2] sm:$0x1] %vm42_vm3, %v57_v31 }
 0x210   :  { %v63_v32 = vld [vmem:[#allocation2] sm:$0x1] }
 0x211   :  { %v65_v33 = vmul.f32 0.125, %v63_v32 }
 0x213   :  { %66 = vst.msk [vmem:[#allocation2] sm:$0x1] %vm42_vm3, %v65_v33 }
 0x214   :  { %102 = shalt.err (!%p99_p4)
}
 0x215   :  { %76 = dma.vmem_to_hbm [thread:$0]  %s74_s13, 16, %s148_s2, [#allocation3]  }
 0x216   :  { %111 = dma.done.wait [#allocation3], 16  }
 0x217   :  { %112 = vsyncadd [#allocation3], 4294967280 }
 0x218   :  { %80 = vsyncpa [#allocation3], 1 }

</bundles_post_ra>
